<compile_context>
chip_gen: v5e
topology: v5e:2x2
jax: 0.10.0
libtpu: 0.0.40
codegen_flags: <defaults>
</compile_context>

<pallas_src>
import functools

import jax
import jax.numpy as jnp
from jax.experimental import pallas as pl
from jax.experimental.pallas import tpu as pltpu

NEG_SLOPE = 0.2  # nn.LeakyReLU(0.2)


def _round_up(x, m):
    return (x + m - 1) // m * m


def _choose_tm(batch, tm_max=512):
    """Batch tile size.

    Large tiles (256-1024 rows) amortize the ~0.35us/grid-step overhead; the
    tile is a multiple of 128 so the lane-dense (1, tm) output block needs no
    masked stores; for batch >= 256 we force >= 2 grid steps so the
    ("parallel",) batch axis can be sharded across v7x's two TensorCores.
    """
    if batch < 256:
        return _round_up(batch, 8)                       # single tile
    return min(tm_max, _round_up(pl.cdiv(batch, 2), 128))


def _vmem_limit_bytes():
    """Generation-aware VMEM limit with ~25% headroom:
    ~96 MiB on v5e/v6e (128 MiB physical), ~48 MiB on v7x (64 MiB physical)."""
    try:
        return int(pltpu.get_tpu_info().vmem_capacity_bytes * 3 // 4)
    except Exception:
        return 48 * 1024 * 1024


def _const_spec(shape):
    """Full-array block, constant index_map -> loaded into VMEM once and kept
    resident across all batch tiles; single-buffered (Buffered(1)) because the
    block index never changes, halving the VMEM taken by weights."""
    index_map = lambda i: (0,) * len(shape)
    try:
        return pl.BlockSpec(shape, index_map, pipeline_mode=pl.Buffered(1))
    except Exception:  # older jax without pipeline_mode / Buffered
        return pl.BlockSpec(shape, index_map)


# ----------------------------------------------------------------------------
# Fused MLP kernel
# ----------------------------------------------------------------------------

def _regressor_kernel(*refs, n_layers):
    """Fused (Linear + LeakyReLU) x n_layers followed by Linear(H, 1).

    refs layout:
      x_ref (tm, H) bf16,
      [w (H,H) bf16, b (1,H) f32] x n_layers,
      w_out (1, H) bf16, b_out (1,) f32 in SMEM,
      o_ref (1, tm) f32.
    All intermediates stay in VMEM/vregs; h is carried in bf16 between layers.
    """
    x_ref = refs[0]
    o_ref = refs[-1]
    wb = refs[1:-1]

    h = x_ref[...]                                     # (tm, H) bf16
    idx = 0
    for _ in range(n_layers):
        w = wb[idx][...]                               # (H, H) bf16
        b = wb[idx + 1][...]                           # (1, H) f32
        idx += 2
        # bf16 x bf16 -> f32 accumulate on the MXU; bias + LeakyReLU epilogue
        # in f32, then back to bf16 for the next layer.
        acc = jnp.dot(h, w, preferred_element_type=jnp.float32) + b
        h = jnp.maximum(acc, NEG_SLOPE * acc).astype(jnp.bfloat16)

    # Head Linear(H, 1): (1,H) . (tm,H)^T -> (1, tm).  Contracting both last
    # dims (a q@k^T-style matmul) gives a lane-dense output row directly, so
    # the store is unmasked instead of tm masked last-dim-1 stores.
    w_out = wb[idx][...]                               # (1, H) bf16
    b_out = wb[idx + 1][0]                             # scalar f32 (SMEM)
    y = jax.lax.dot_general(
        w_out, h, (((1,), (1,)), ((), ())),
        preferred_element_type=jnp.float32)            # (1, tm)
    o_ref[...] = y + b_out


def regressor_forward(params, crys_fea, *, tm_max=512):
    """crys_fea: (B, h_fea_len) -> (B, 1) f32."""
    B, H = crys_fea.shape
    # Stream the activations in bf16 (no-op if already bf16; under jit the
    # cast fuses with the producer).  Mixed precision: expect O(1e-2) relative
    # deviation from a pure-f32 reference.
    x = crys_fea.astype(jnp.bfloat16)

    layers = [params["conv_to_fc"]] + list(params["fcs"])
    n_layers = len(layers)

    tm = _choose_tm(B, tm_max)
    num_tiles = pl.cdiv(B, tm)
    b_pad = num_tiles * tm

    in_specs = [pl.BlockSpec((tm, H), lambda i: (i, 0))]
    args = [x]
    for (w, b) in layers:
        in_specs += [_const_spec(w.shape), _const_spec(b.shape)]
        args += [w, b]
    w_out, b_out = params["fc_out"]
    in_specs += [_const_spec(w_out.shape),
                 pl.BlockSpec(memory_space=pltpu.MemorySpace.SMEM)]
    args += [w_out, b_out]

    # Lane-dense output: one (1, tm) row block per grid step.
    out_spec = pl.BlockSpec((1, tm), lambda i: (0, i))

    out_row = pl.pallas_call(
        functools.partial(_regressor_kernel, n_layers=n_layers),
        out_shape=jax.ShapeDtypeStruct((1, b_pad), jnp.float32),
        grid=(num_tiles,),
        in_specs=in_specs,
        out_specs=out_spec,
        compiler_params=pltpu.CompilerParams(
            dimension_semantics=("parallel",),      # megacore split on v7x
            vmem_limit_bytes=_vmem_limit_bytes(),
        ),
    )(*args)

    return out_row[0, :B].reshape(B, 1)


# ----------------------------------------------------------------------------
# Parameter construction (shapes per Regressor.__init__)
# ----------------------------------------------------------------------------

def _init_linear(key, fan_in, fan_out):
    """PyTorch-style uniform(-1/sqrt(fan_in), 1/sqrt(fan_in)) init; weight is
    stored pre-transposed to (in, out)."""
    k1, k2 = jax.random.split(key)
    bound = 1.0 / jnp.sqrt(jnp.float32(fan_in))
    w = jax.random.uniform(k1, (fan_in, fan_out), jnp.float32, -bound, bound)
    b = jax.random.uniform(k2, (fan_out,), jnp.float32, -bound, bound)
    return w, b


def build_regressor_params(key, h_fea_len, n_h):
    keys = iter(jax.random.split(key, 2 * (n_h + 2)))
    params = {}

    # conv_to_fc: Linear(h_fea_len, h_fea_len)
    w, b = _init_linear(next(keys), h_fea_len, h_fea_len)
    params["conv_to_fc"] = (w.astype(jnp.bfloat16), b.reshape(1, h_fea_len))

    # fcs: (n_h - 1) x Linear(h_fea_len, h_fea_len)
    fcs = []
    for _ in range(max(n_h - 1, 0)):
        w, b = _init_linear(next(keys), h_fea_len, h_fea_len)
        fcs.append((w.astype(jnp.bfloat16), b.reshape(1, h_fea_len)))
    params["fcs"] = fcs

    # fc_out: Linear(h_fea_len, 1) -- stored as a (1, H) bf16 row for the
    # trans_b head matmul; scalar bias kept f32 and placed in SMEM.
    w, b = _init_linear(next(keys), h_fea_len, 1)
    params["fc_out"] = (w.reshape(1, h_fea_len).astype(jnp.bfloat16),
                        b.reshape(1))

    # NOTE: BatchNorm1d layers exist in the PyTorch __init__ but are never
    # applied in forward(), so no parameters are created for them here.
    return params


def regressor_reference(params, crys_fea):
    """Pure-jnp reference (same bf16 weights, f32 activations) for validation."""
    h = crys_fea.astype(jnp.float32)
    for (w, b) in [params["conv_to_fc"]] + list(params["fcs"]):
        h = h @ w.astype(jnp.float32) + b
        h = jnp.where(h > 0, h, NEG_SLOPE * h)
    w_out, b_out = params["fc_out"]
    return h @ w_out.astype(jnp.float32).T + b_out.reshape(1, 1)


# ----------------------------------------------------------------------------

if __name__ == "__main__":
    key = jax.random.PRNGKey(0)
    pkey, xkey = jax.random.split(key)

    H_FEA_LEN = 128   # h_fea_len (lane-aligned)
    N_H = 3           # -> conv_to_fc + 2 hidden fcs + fc_out
    BATCH = 16

    params = build_regressor_params(pkey, H_FEA_LEN, N_H)
    crys_fea = jax.random.normal(xkey, (BATCH, H_FEA_LEN), jnp.float32)

    fwd = jax.jit(regressor_forward)
    out = fwd(params, crys_fea)
    out = jax.block_until_ready(out)

    assert out.shape == (BATCH, 1), out.shape
    assert out.dtype == jnp.float32
    assert bool(jnp.all(jnp.isfinite(out)))

    ref = regressor_reference(params, crys_fea)
    assert bool(jnp.allclose(out, ref, rtol=5e-2, atol=5e-2)), (
        float(jnp.max(jnp.abs(out - ref))))

    print("KERNEL_OK")
</pallas_src>

<mosaic_0001>
module attributes {stable_mosaic.version = 11 : i64} {
  func.func @_regressor_kernel(%arg0: i32, %arg1: memref<16x128xbf16, #tpu.memory_space<vmem>>, %arg2: memref<128x128xbf16, #tpu.memory_space<vmem>>, %arg3: memref<1x128xf32, #tpu.memory_space<vmem>>, %arg4: memref<128x128xbf16, #tpu.memory_space<vmem>>, %arg5: memref<1x128xf32, #tpu.memory_space<vmem>>, %arg6: memref<128x128xbf16, #tpu.memory_space<vmem>>, %arg7: memref<1x128xf32, #tpu.memory_space<vmem>>, %arg8: memref<1x128xbf16, #tpu.memory_space<vmem>>, %arg9: memref<1xf32, #tpu.memory_space<smem>>, %arg10: memref<1x16xf32, #tpu.memory_space<vmem>>) attributes {dimension_semantics = [#tpu.dimension_semantics<parallel>], iteration_bounds = array<i64: 1>, scalar_prefetch = 0 : i64, scratch_operands = 0 : i64, tpu.core_type = #tpu.core_type<tc>, window_params = [{transform_indices = @transform_0, window_bounds = array<i64: 16, 128>}, {pipeline_mode = #tpu.pipeline_mode<synchronous>, transform_indices = @transform_1, window_bounds = array<i64: 128, 128>}, {pipeline_mode = #tpu.pipeline_mode<synchronous>, transform_indices = @transform_2, window_bounds = array<i64: 1, 128>}, {pipeline_mode = #tpu.pipeline_mode<synchronous>, transform_indices = @transform_3, window_bounds = array<i64: 128, 128>}, {pipeline_mode = #tpu.pipeline_mode<synchronous>, transform_indices = @transform_4, window_bounds = array<i64: 1, 128>}, {pipeline_mode = #tpu.pipeline_mode<synchronous>, transform_indices = @transform_5, window_bounds = array<i64: 128, 128>}, {pipeline_mode = #tpu.pipeline_mode<synchronous>, transform_indices = @transform_6, window_bounds = array<i64: 1, 128>}, {pipeline_mode = #tpu.pipeline_mode<synchronous>, transform_indices = @transform_7, window_bounds = array<i64: 1, 128>}, {transform_indices = @transform_8, window_bounds = array<i64: 1>}, {transform_indices = @transform_9, window_bounds = array<i64: 1, 16>}]} {
    %c0 = arith.constant 0 : index
    %c0_0 = arith.constant 0 : index
    %0 = vector.load %arg1[%c0, %c0_0] : memref<16x128xbf16, #tpu.memory_space<vmem>>, vector<16x128xbf16>
    %c0_1 = arith.constant 0 : index
    %c0_2 = arith.constant 0 : index
    %1 = vector.load %arg2[%c0_1, %c0_2] : memref<128x128xbf16, #tpu.memory_space<vmem>>, vector<128x128xbf16>
    %c0_3 = arith.constant 0 : index
    %c0_4 = arith.constant 0 : index
    %2 = vector.load %arg3[%c0_3, %c0_4] : memref<1x128xf32, #tpu.memory_space<vmem>>, vector<1x128xf32>
    %cst = arith.constant dense<0.000000e+00> : vector<16x128xf32>
    %3 = tpu.matmul %0, %1, %cst {dimension_numbers = #tpu.dot_dimension_numbers<[1], [0], [0], [1], [0, 0, 1, 1], [], []>} : vector<16x128xbf16>, vector<128x128xbf16>, vector<16x128xf32> -> vector<16x128xf32>
    %4 = vector.broadcast %2 : vector<1x128xf32> to vector<16x128xf32>
    %5 = arith.addf %3, %4 : vector<16x128xf32>
    %cst_5 = arith.constant 2.000000e-01 : f32
    %6 = vector.broadcast %cst_5 : f32 to vector<16x128xf32>
    %7 = arith.mulf %6, %5 : vector<16x128xf32>
    %8 = arith.maximumf %5, %7 : vector<16x128xf32>
    %9 = arith.truncf %8 : vector<16x128xf32> to vector<16x128xbf16>
    %c0_6 = arith.constant 0 : index
    %c0_7 = arith.constant 0 : index
    %10 = vector.load %arg4[%c0_6, %c0_7] : memref<128x128xbf16, #tpu.memory_space<vmem>>, vector<128x128xbf16>
    %c0_8 = arith.constant 0 : index
    %c0_9 = arith.constant 0 : index
    %11 = vector.load %arg5[%c0_8, %c0_9] : memref<1x128xf32, #tpu.memory_space<vmem>>, vector<1x128xf32>
    %cst_10 = arith.constant dense<0.000000e+00> : vector<16x128xf32>
    %12 = tpu.matmul %9, %10, %cst_10 {dimension_numbers = #tpu.dot_dimension_numbers<[1], [0], [0], [1], [0, 0, 1, 1], [], []>} : vector<16x128xbf16>, vector<128x128xbf16>, vector<16x128xf32> -> vector<16x128xf32>
    %13 = vector.broadcast %11 : vector<1x128xf32> to vector<16x128xf32>
    %14 = arith.addf %12, %13 : vector<16x128xf32>
    %cst_11 = arith.constant 2.000000e-01 : f32
    %15 = vector.broadcast %cst_11 : f32 to vector<16x128xf32>
    %16 = arith.mulf %15, %14 : vector<16x128xf32>
    %17 = arith.maximumf %14, %16 : vector<16x128xf32>
    %18 = arith.truncf %17 : vector<16x128xf32> to vector<16x128xbf16>
    %c0_12 = arith.constant 0 : index
    %c0_13 = arith.constant 0 : index
    %19 = vector.load %arg6[%c0_12, %c0_13] : memref<128x128xbf16, #tpu.memory_space<vmem>>, vector<128x128xbf16>
    %c0_14 = arith.constant 0 : index
    %c0_15 = arith.constant 0 : index
    %20 = vector.load %arg7[%c0_14, %c0_15] : memref<1x128xf32, #tpu.memory_space<vmem>>, vector<1x128xf32>
    %cst_16 = arith.constant dense<0.000000e+00> : vector<16x128xf32>
    %21 = tpu.matmul %18, %19, %cst_16 {dimension_numbers = #tpu.dot_dimension_numbers<[1], [0], [0], [1], [0, 0, 1, 1], [], []>} : vector<16x128xbf16>, vector<128x128xbf16>, vector<16x128xf32> -> vector<16x128xf32>
    %22 = vector.broadcast %20 : vector<1x128xf32> to vector<16x128xf32>
    %23 = arith.addf %21, %22 : vector<16x128xf32>
    %cst_17 = arith.constant 2.000000e-01 : f32
    %24 = vector.broadcast %cst_17 : f32 to vector<16x128xf32>
    %25 = arith.mulf %24, %23 : vector<16x128xf32>
    %26 = arith.maximumf %23, %25 : vector<16x128xf32>
    %27 = arith.truncf %26 : vector<16x128xf32> to vector<16x128xbf16>
    %c0_18 = arith.constant 0 : index
    %c0_19 = arith.constant 0 : index
    %28 = vector.load %arg8[%c0_18, %c0_19] : memref<1x128xbf16, #tpu.memory_space<vmem>>, vector<1x128xbf16>
    %c0_20 = arith.constant 0 : index
    %29 = memref.load %arg9[%c0_20] : memref<1xf32, #tpu.memory_space<smem>>
    %cst_21 = arith.constant dense<0.000000e+00> : vector<1x16xf32>
    %30 = tpu.matmul %28, %27, %cst_21 {dimension_numbers = #tpu.dot_dimension_numbers<[1], [1], [0], [0], [0, 0, 1, 0], [], []>} : vector<1x128xbf16>, vector<16x128xbf16>, vector<1x16xf32> -> vector<1x16xf32>
    %31 = vector.broadcast %29 : f32 to vector<1x16xf32>
    %32 = arith.addf %30, %31 : vector<1x16xf32>
    %c0_22 = arith.constant 0 : index
    %c0_23 = arith.constant 0 : index
    %33 = vector.load %arg10[%c0_22, %c0_23] : memref<1x16xf32, #tpu.memory_space<vmem>>, vector<1x16xf32>
    tpu.vector_store %arg10[%c0_22, %c0_23], %32 {strides = array<i32>} : memref<1x16xf32, #tpu.memory_space<vmem>>, vector<1x16xf32>,
    return
  }
  func.func @transform_0(%arg0: i32) -> (i32, i32) {
    %c0_i32 = arith.constant 0 : i32
    %c0_i32_0 = arith.constant 0 : i32
    return %arg0, %c0_i32 : i32, i32
  }
  func.func @transform_1(%arg0: i32) -> (i32, i32) {
    %c0_i32 = arith.constant 0 : i32
    %c0_i32_0 = arith.constant 0 : i32
    %c0_i32_1 = arith.constant 0 : i32
    return %c0_i32, %c0_i32_0 : i32, i32
  }
  func.func @transform_2(%arg0: i32) -> (i32, i32) {
    %c0_i32 = arith.constant 0 : i32
    %c0_i32_0 = arith.constant 0 : i32
    %c0_i32_1 = arith.constant 0 : i32
    return %c0_i32, %c0_i32_0 : i32, i32
  }
  func.func @transform_3(%arg0: i32) -> (i32, i32) {
    %c0_i32 = arith.constant 0 : i32
    %c0_i32_0 = arith.constant 0 : i32
    %c0_i32_1 = arith.constant 0 : i32
    return %c0_i32, %c0_i32_0 : i32, i32
  }
  func.func @transform_4(%arg0: i32) -> (i32, i32) {
    %c0_i32 = arith.constant 0 : i32
    %c0_i32_0 = arith.constant 0 : i32
    %c0_i32_1 = arith.constant 0 : i32
    return %c0_i32, %c0_i32_0 : i32, i32
  }
  func.func @transform_5(%arg0: i32) -> (i32, i32) {
    %c0_i32 = arith.constant 0 : i32
    %c0_i32_0 = arith.constant 0 : i32
    %c0_i32_1 = arith.constant 0 : i32
    return %c0_i32, %c0_i32_0 : i32, i32
  }
  func.func @transform_6(%arg0: i32) -> (i32, i32) {
    %c0_i32 = arith.constant 0 : i32
    %c0_i32_0 = arith.constant 0 : i32
    %c0_i32_1 = arith.constant 0 : i32
    return %c0_i32, %c0_i32_0 : i32, i32
  }
  func.func @transform_7(%arg0: i32) -> (i32, i32) {
    %c0_i32 = arith.constant 0 : i32
    %c0_i32_0 = arith.constant 0 : i32
    %c0_i32_1 = arith.constant 0 : i32
    return %c0_i32, %c0_i32_0 : i32, i32
  }
  func.func @transform_8(%arg0: i32) -> i32 {
    %c0_i32 = arith.constant 0 : i32
    %c0_i32_0 = arith.constant 0 : i32
    return %c0_i32 : i32
  }
  func.func @transform_9(%arg0: i32) -> (i32, i32) {
    %c0_i32 = arith.constant 0 : i32
    %c0_i32_0 = arith.constant 0 : i32
    return %c0_i32, %arg0 : i32, i32
  }
}

</mosaic_0001>

<bundles_post_ra>
// kernel: regressor_forward.1
= control target key start
LH: loop header
LB: loop body
LE: loop exit
PB: predicated region body
PF: predicated region fallthrough
CT: control target
= control target key end

     0   :  { %15 = vsyncpa [#allocation4], 0  ;;  %s709_s0 = inlined_call_operand.vmem [shape: bf16[16,128], index: 0, kind: input, shape index: {}]   ;;  %s710_s1 = inlined_call_operand.hbm [shape: bf16[128,128], index: 1, kind: input, shape index: {}]   ;;  %s711_s2 = inlined_call_operand.vmem [shape: f32[1,128], index: 2, kind: input, shape index: {}]   ;;  %s712_s3 = inlined_call_operand.hbm [shape: bf16[128,128], index: 3, kind: input, shape index: {}]   ;;  %s713_s4 = inlined_call_operand.vmem [shape: f32[1,128], index: 4, kind: input, shape index: {}]   ;;  %s714_s5 = inlined_call_operand.hbm [shape: bf16[128,128], index: 5, kind: input, shape index: {}]   ;;  %s715_s6 = inlined_call_operand.vmem [shape: f32[1,128], index: 6, kind: input, shape index: {}]   ;;  %s716_s7 = inlined_call_operand.vmem [shape: bf16[1,128], index: 7, kind: input, shape index: {}]   ;;  %s717_s8 = inlined_call_operand.<no memory space> [shape: f32[1], index: 8, kind: input, shape index: {}]   ;;  %s718_s9 = inlined_call_operand.hbm [shape: f32[1,16], index: 9, kind: output, shape index: {}]  }
   0x1   :  { %16 = vsyncpa [#allocation7], 0 }
   0x2   :  { %17 = vsyncpa [#allocation5], 0  ;;  %s39_s11 = sshll.u32 %s712_s3, 4  ;;  %s623_s12 = smov [#allocation6]   ;;  %s40_s11 = int_to_ptr.hbm [resolvable:$true] %s39_s11 }
   0x3   :  { %s41_s13 = sshll.u32 %s623_s12, 4  ;;  %s24_s16 = sshll.u32 %s710_s1, 4  ;;  %s42_s13 = int_to_ptr.vmem [resolvable:$true] %s41_s13  ;;  %s25_s16 = int_to_ptr.hbm [resolvable:$true] %s24_s16 }
   0x4   :  { %s624_s17 = smov 64   ;;  %s625_s18 = smov 4  }
   0x5   :  { %47 = dma.hbm_to_vmem [thread:$0]  %s40_s11, 1024, %s42_s13, [#allocation7], %s624_s17, %s624_s17, %s625_s18  }
   0x6   :  { %s626_s19 = smov [#allocation3]   ;;  %s54_s23 = sshll.u32 %s714_s5, 4  ;;  %s55_s23 = int_to_ptr.hbm [resolvable:$true] %s54_s23 }
   0x7   :  { %s26_s20 = sshll.u32 %s626_s19, 4  ;;  %s627_s3 = smov [#allocation8]   ;;  %s27_s20 = int_to_ptr.vmem [resolvable:$true] %s26_s20 }
   0x8   :  { %32 = dma.hbm_to_vmem [thread:$0]  %s25_s16, 1024, %s27_s20, [#allocation4], %s624_s17, %s624_s17, %s625_s18  }
   0x9   :  { %s56_s24 = sshll.u32 %s627_s3, 4  ;;  %s57_s24 = int_to_ptr.vmem [resolvable:$true] %s56_s24 }
   0xa   :  { %62 = dma.hbm_to_vmem [thread:$0]  %s55_s23, 1024, %s57_s24, [#allocation7], %s624_s17, %s624_s17, %s625_s18  }
   0xb   :  { %617 = dma.done.wait [#allocation4], 1024  }
   0xc   :  { %618 = vsyncadd [#allocation4], 4294966272 }
   0xd   :  { %619 = dma.done.wait [#allocation7], 2048  }
   0xe   :  { %620 = vsyncadd [#allocation7], 4294965248  ;;  %v495_v0 = vld [vmem:[#allocation3 + $0x38] sm:$0xff]  ;;  %v494_v1 = vld [vmem:[#allocation3 + $0x30] sm:$0xff]  ;;  %v353_v56 = vstv %s717_s8  ;;  %s628_s11 = smov [#allocation9]   ;;  %s376_s14 = sshll.u32 %s718_s9, 4  ;;  %s377_s14 = int_to_ptr.hbm [resolvable:$true] %s376_s14 }
   0xf   :  { %158 = vmatpush.bf16.msra.mxu0 %v495_v0  ;;  %v503_v2 = vld [vmem:[#allocation6 + $0x38] sm:$0xff]  ;;  %v502_v3 = vld [vmem:[#allocation6 + $0x30] sm:$0xff]  ;;  %v493_v4 = vld [vmem:[#allocation3 + $0x28] sm:$0xff]  ;;  %vm367_vm0 = vcmask 122880  }
  0x10   :  { %245 = vmatpush.bf16.msra.mxu1 %v503_v2  ;;  %v501_v5 = vld [vmem:[#allocation6 + $0x28] sm:$0xff]  ;;  %v492_v6 = vld [vmem:[#allocation3 + $0x20] sm:$0xff]  ;;  %v491_v8 = vld [vmem:[#allocation3 + $0x18] sm:$0xff] }
  0x11   :  { %v500_v7 = vld [vmem:[#allocation6 + $0x20] sm:$0xff]  ;;  %v490_v9 = vld [vmem:[#allocation3 + $0x10] sm:$0xff]  ;;  %v489_v10 = vld [vmem:[#allocation3 + $0x8] sm:$0xff] }
  0x12   :  { %v488_v11 = vld [vmem:[#allocation3] sm:$0xff]  ;;  %v499_v13 = vld [vmem:[#allocation6 + $0x18] sm:$0xff]  ;;  %v498_v14 = vld [vmem:[#allocation6 + $0x10] sm:$0xff] }
  0x13   :  { %159 = vmatpush.bf16.msra.mxu0 %v494_v1  ;;  %v487_v12 = vld [vmem:[%s709_s0] sm:$0xff]  ;;  %v497_v15 = vld [vmem:[#allocation6 + $0x8] sm:$0xff]  ;;  %v511_v17 = vld [vmem:[#allocation8 + $0x38] sm:$0xff] }
  0x14   :  { %246 = vmatpush.bf16.msra.mxu1 %v502_v3  ;;  %v496_v16 = vld [vmem:[#allocation6] sm:$0xff]  ;;  %332 = vmatpush.bf16.msra.mxu2 %v511_v17  ;;  %v510_v18 = vld [vmem:[#allocation8 + $0x30] sm:$0xff]  ;;  %v509_v19 = vld [vmem:[#allocation8 + $0x28] sm:$0xff] }
  0x15   :  { %v508_v20 = vld [vmem:[#allocation8 + $0x20] sm:$0xff]  ;;  %v507_v31 = vld [vmem:[#allocation8 + $0x18] sm:$0xff]  ;;  %v506_v32 = vld [vmem:[#allocation8 + $0x10] sm:$0xff] }
  0x16   :  { %v518_v22 = vld [vmem:[%s711_s2] ss:$0 sm:$0xff]  ;;  %v505_v33 = vld [vmem:[#allocation8 + $0x8] sm:$0xff] }
  0x17   :  { %160 = vmatpush.bf16.msra.mxu0 %v493_v4  ;;  %v504_v34 = vld [vmem:[#allocation8] sm:$0xff] }
  0x18   :  { %247 = vmatpush.bf16.msra.mxu1 %v501_v5  ;;  %333 = vmatpush.bf16.msra.mxu2 %v510_v18  ;;  %v519_v36 = vld [vmem:[%s713_s4] ss:$0 sm:$0xff] }
  0x19   :  { %v520_v46 = vld [vmem:[%s715_s6] ss:$0 sm:$0xff]  ;;  %s374_s6 = sshll.u32 %s628_s11, 4  ;;  %s375_s6 = int_to_ptr.vmem [resolvable:$true] %s374_s6 }
  0x1a   :  { %v351_v55 = vld [vmem:[%s716_s7] sm:$0x1] }
  0x1b   :  { %161 = vmatpush.bf16.msra.mxu0 %v492_v6 }
  0x1c   :  { %248 = vmatpush.bf16.msra.mxu1 %v500_v7  ;;  %334 = vmatpush.bf16.msra.mxu2 %v509_v19 }
  0x1f   :  { %162 = vmatpush.bf16.msra.mxu0 %v491_v8 }
  0x20   :  { %249 = vmatpush.bf16.msra.mxu1 %v499_v13  ;;  %335 = vmatpush.bf16.msra.mxu2 %v508_v20 }
  0x23   :  { %163 = vmatpush.bf16.msra.mxu0 %v490_v9 }
  0x24   :  { %250 = vmatpush.bf16.msra.mxu1 %v498_v14  ;;  %336 = vmatpush.bf16.msra.mxu2 %v507_v31 }
  0x27   :  { %164 = vmatpush.bf16.msra.mxu0 %v489_v10 }
  0x28   :  { %251 = vmatpush.bf16.msra.mxu1 %v497_v15  ;;  %337 = vmatpush.bf16.msra.mxu2 %v506_v32 }
  0x2b   :  { %165 = vmatpush.bf16.msra.mxu0 %v488_v11 }
  0x2c   :  { %252 = vmatpush.bf16.msra.mxu1 %v496_v16  ;;  %338 = vmatpush.bf16.msra.mxu2 %v505_v33 }
  0x2e   :  { %166 = vmatmul.bf16.vlgmr.msra.gmra.mxu0 %v487_v12 }
  0x30   :  { %339 = vmatpush.bf16.msra.mxu2 %v504_v34 }
  0xab   :  { %v167_v21 = vpop.f32.mrf.mxu0 }
  0xac   :  { %v168_v23 = vadd.f32 %v518_v22, %v167_v21 }
  0xae   :  { %v172_v25 = vmul.f32 0.2, %v168_v23 }
  0xb0   :  { %v174_v28 = vmax.f32 %v168_v23, %v172_v25 }
  0xb3   :  { %v169_v24 = vpop.f32.mrf.mxu0 }
  0xb4   :  { %v170_v26 = vadd.f32 %v518_v22, %v169_v24 }
  0xb6   :  { %v173_v27 = vmul.f32 0.2, %v170_v26 }
  0xb8   :  { %v175_v29 = vmax.f32 %v170_v26, %v173_v27 }
  0xba   :  { %v176_v30 = vpack.c.bf16 %v175_v29, %v174_v28 }
  0xbc   :  { %253 = vmatmul.bf16.vlgmr.msra.gmra.mxu1 %v176_v30 }
 0x139   :  { %v254_v35 = vpop.f32.mrf.mxu1 }
 0x13a   :  { %v255_v37 = vadd.f32 %v519_v36, %v254_v35 }
 0x13c   :  { %v259_v39 = vmul.f32 0.2, %v255_v37 }
 0x13e   :  { %v261_v42 = vmax.f32 %v255_v37, %v259_v39 }
 0x141   :  { %v256_v38 = vpop.f32.mrf.mxu1 }
 0x142   :  { %v257_v40 = vadd.f32 %v519_v36, %v256_v38 }
 0x144   :  { %v260_v41 = vmul.f32 0.2, %v257_v40 }
 0x146   :  { %v262_v43 = vmax.f32 %v257_v40, %v260_v41 }
 0x148   :  { %v263_v44 = vpack.c.bf16 %v262_v43, %v261_v42 }
 0x14a   :  { %340 = vmatmul.bf16.vlgmr.msra.gmra.mxu2 %v263_v44 }
 0x1cd   :  { %v341_v45 = vpop.f32.mrf.mxu2 }
 0x1ce   :  { %v342_v47 = vadd.f32 %v520_v46, %v341_v45 }
 0x1d0   :  { %v346_v49 = vmul.f32 0.2, %v342_v47 }
 0x1d2   :  { %v348_v52 = vmax.f32 %v342_v47, %v346_v49 }
 0x1d5   :  { %v343_v48 = vpop.f32.mrf.mxu2 }
 0x1d6   :  { %v344_v50 = vadd.f32 %v520_v46, %v343_v48 }
 0x1d8   :  { %v347_v51 = vmul.f32 0.2, %v344_v50 }
 0x1da   :  { %v349_v53 = vmax.f32 %v344_v50, %v347_v51 }
 0x1dc   :  { %v350_v54 = vpack.c.bf16 %v349_v53, %v348_v52 }
 0x1de   :  { %361 = vmatpush.bf16.xpose.msra.mxu3 %v350_v54 }
 0x1e5   :  { %362 = vmatmul.bf16.vlgmr.msra.gmra.mxu3 %v351_v55 }
 0x268   :  { %v363_v57 = vpop.f32.mrf.mxu3 }
 0x269   :  { %v364_v58 = vadd.f32 %v363_v57, %v353_v56 }
 0x26b   :  { %368 = vst.msk [vmem:[#allocation9] sm:$0x1] %vm367_vm0, %v364_v58 }
 0x26c   :  { %379 = dma.vmem_to_hbm [thread:$0]  %s375_s6, 16, %s377_s14, [#allocation5]  }
 0x270   :  { %v365_v59 = vpop.f32.mrf.mxu3 }
 0x271   :  { %621 = dma.done.wait [#allocation5], 16  }
 0x272   :  { %622 = vsyncadd [#allocation5], 4294967280 }
 0x273   :  { %384 = vsyncpa [#allocation4], 1 }
 0x274   :  { %385 = vsyncpa [#allocation7], 1 }
 0x275   :  { %386 = vsyncpa [#allocation5], 1 }

</bundles_post_ra>
